<compile_context>
chip_gen: v7x
topology: tpu7x:2x2x1
jax: 0.10.0
libtpu: 0.0.40
codegen_flags: <defaults>
</compile_context>

<pallas_src>
import math

import jax
import jax.numpy as jnp
from jax.experimental import pallas as pl
from jax.experimental.pallas import tpu as pltpu


LN_EPS = 1e-5
_SQRT_2_OVER_PI = math.sqrt(2.0 / math.pi)


def _gelu_tanh(x):
    # PyTorch nn.GELU(approximate='tanh')
    return 0.5 * x * (1.0 + jnp.tanh(_SQRT_2_OVER_PI * (x + 0.044715 * x * x * x)))


def _layernorm_f32(x, gamma, beta):
    mu = jnp.mean(x, axis=-1, keepdims=True)
    xc = x - mu
    var = jnp.mean(xc * xc, axis=-1, keepdims=True)
    return xc * jax.lax.rsqrt(var + LN_EPS) * gamma + beta


def block_kernel(
    x_ref,                    # (TM, E)  input rows (f32 or bf16 at the boundary)
    g1_ref, b1_ref,           # (1, E)   ln_1 gamma/beta, f32
    wa_ref, ba_ref,           # (E, E) bf16 fused attn weight, (1, E) f32 fused bias
    g2_ref, b2_ref,           # (1, E)   ln_2 gamma/beta, f32
    wfc_ref, bfc_ref,         # (E, 4E) bf16, (1, 4E) f32  mlp.c_fc
    wpr_ref, bpr_ref,         # (4E, E) bf16, (1, E) f32   mlp.c_proj
    o_ref,                    # (TM, E)  output rows
):
    # Residual / LayerNorm math is f32 regardless of the I/O dtype.
    x = x_ref[...].astype(jnp.float32)
    # Hoist small operands once.
    g1 = g1_ref[...]
    b1 = b1_ref[...]
    g2 = g2_ref[...]
    b2 = b2_ref[...]
    ba = ba_ref[...]
    bfc = bfc_ref[...]
    bpr = bpr_ref[...]

    # ---- x = x + attn(ln_1(x));  attn(x) == ln1(x) @ (Wv@Wp) + fused bias ----
    h1 = _layernorm_f32(x, g1, b1).astype(jnp.bfloat16)
    attn_out = jnp.dot(h1, wa_ref[...], preferred_element_type=jnp.float32) + ba
    x = x + attn_out

    # ---- x = x + mlp(ln_2(x)) ------------------------------------------------
    h2 = _layernorm_f32(x, g2, b2).astype(jnp.bfloat16)
    fc = jnp.dot(h2, wfc_ref[...], preferred_element_type=jnp.float32) + bfc
    act = _gelu_tanh(fc).astype(jnp.bfloat16)
    mlp_out = jnp.dot(act, wpr_ref[...], preferred_element_type=jnp.float32) + bpr

    o_ref[...] = (x + mlp_out).astype(o_ref.dtype)


def prepare_block_params(params, n_embed):
    """One-time glue: slice / transpose / fold the attention projections / bf16 cast."""
    E = n_embed
    w_attn = params["attn.c_attn.weight"]            # (3E, E) torch (out, in)
    b_attn = params["attn.c_attn.bias"]              # (3E,)

    # v  = h1 @ Wv_t + bv         with Wv_t = W_attn[2E:3E,:].T  (E, E)
    # out = v @ Wp_t + bp         with Wp_t = Wp_torch.T         (E, E)
    # Fold in f32 BEFORE the bf16 cast (keeps rounding comparable):
    wv_t = w_attn[2 * E: 3 * E, :].T.astype(jnp.float32)
    wp_t = params["attn.c_proj.weight"].T.astype(jnp.float32)
    bv = b_attn[2 * E: 3 * E].reshape(1, E).astype(jnp.float32)
    bp = params["attn.c_proj.bias"].reshape(1, E).astype(jnp.float32)
    wa = (wv_t @ wp_t).astype(jnp.bfloat16)          # (E, E)  fused attention weight
    ba = bv @ wp_t + bp                              # (1, E)  fused attention bias, f32

    return {
        "g1": params["ln_1.weight"].reshape(1, E).astype(jnp.float32),
        "b1": params["ln_1.bias"].reshape(1, E).astype(jnp.float32),
        "wa": wa,
        "ba": ba,
        "g2": params["ln_2.weight"].reshape(1, E).astype(jnp.float32),
        "b2": params["ln_2.bias"].reshape(1, E).astype(jnp.float32),
        "wfc_t": params["mlp.c_fc.weight"].T.astype(jnp.bfloat16),   # (E, 4E)
        "bfc": params["mlp.c_fc.bias"].reshape(1, 4 * E).astype(jnp.float32),
        "wpr_t": params["mlp.c_proj.weight"].T.astype(jnp.bfloat16), # (4E, E)
        "bpr": params["mlp.c_proj.bias"].reshape(1, E).astype(jnp.float32),
    }


def _vmem_capacity_bytes():
    try:
        return int(pltpu.get_tpu_info().vmem_capacity_bytes)
    except Exception:
        return 64 << 20          # conservative fallback (v7x per-TC VMEM)


def _tile_footprint_bytes(row_tile, E, io_bytes, weight_bytes):
    tile_io = row_tile * E * io_bytes * 2 * 2          # x in + out, double-buffered
    smalls = (6 * E + 2 * 4 * E) * 4 * 2               # gammas/betas/biases
    interm = row_tile * 4 * E * 4 * 2 + row_tile * E * 4 * 4  # (TM,4E)+(TM,E) f32 live
    return weight_bytes + tile_io + smalls + interm


def _pick_row_tile(n_rows, E, io_bytes, weight_bytes, vmem_cap):
    # Sublane alignment for the row axis: 8 for f32 I/O, 16 for bf16 I/O.
    align = 16 if io_bytes == 2 else 8
    # Largest tile <= 512 whose footprint fits in ~60% of this chip's VMEM.
    tile = 512
    while tile > align and _tile_footprint_bytes(tile, E, io_bytes, weight_bytes) > 0.6 * vmem_cap:
        tile //= 2
    # Keep >= 2 grid steps when possible: with dimension_semantics=('parallel',)
    # the row axis is the only thing v7x megacore can shard across its 2 TCs.
    if n_rows > align:
        half = -(-n_rows // 2)
        half = -(-half // align) * align
        tile = min(tile, max(align, half))
    # Never exceed the (aligned) problem size.
    tile = min(tile, -(-n_rows // align) * align)
    return max(align, tile)


def _vmem_limit_bytes(row_tile, E, io_bytes, weight_bytes, vmem_cap):
    # Weights are single-buffered (pl.Buffered(1), constant index_map).
    total = _tile_footprint_bytes(row_tile, E, io_bytes, weight_bytes) + (8 << 20)
    return int(min(max(total, 32 << 20), int(0.8 * vmem_cap)))


def gpt2_block_forward(x, prep, *, row_tile=None):
    """x: (B, T, E).  prep: output of prepare_block_params.  Returns (B, T, E) in x.dtype."""
    B, T, E = x.shape
    N = B * T

    # Small-E configs are activation-DMA-bound -> move activations in bf16.
    io_dtype = jnp.bfloat16 if E <= 256 else x.dtype
    io_bytes = jnp.dtype(io_dtype).itemsize

    weight_bytes = sum(int(prep[k].size) * 2 for k in ("wa", "wfc_t", "wpr_t"))
    vmem_cap = _vmem_capacity_bytes()

    if row_tile is None:
        row_tile = _pick_row_tile(N, E, io_bytes, weight_bytes, vmem_cap)

    x2d = x.reshape(N, E).astype(io_dtype)
    n_pad = ((N + row_tile - 1) // row_tile) * row_tile
    if n_pad != N:
        x2d = jnp.pad(x2d, ((0, n_pad - N), (0, 0)))
    grid = (n_pad // row_tile,)

    row_spec = pl.BlockSpec((row_tile, E), lambda i: (i, 0))
    # Constant-index weights/biases: single-buffer them (nothing to pipeline).
    const = lambda a: pl.BlockSpec(a.shape, lambda i: (0,) * a.ndim,
                                   pipeline_mode=pl.Buffered(1))

    cost = pl.CostEstimate(
        flops=18 * n_pad * E * E,                     # folded attn (2E^2) + MLP (16E^2)
        transcendentals=n_pad * 4 * E,                # tanh in GELU
        bytes_accessed=2 * n_pad * E * io_bytes + weight_bytes + 22 * E * 4,
    )

    out2d = pl.pallas_call(
        block_kernel,
        out_shape=jax.ShapeDtypeStruct((n_pad, E), io_dtype),
        grid_spec=pltpu.PrefetchScalarGridSpec(
            num_scalar_prefetch=0,
            grid=grid,
            in_specs=[
                row_spec,
                const(prep["g1"]), const(prep["b1"]),
                const(prep["wa"]), const(prep["ba"]),
                const(prep["g2"]), const(prep["b2"]),
                const(prep["wfc_t"]), const(prep["bfc"]),
                const(prep["wpr_t"]), const(prep["bpr"]),
            ],
            out_specs=row_spec,
        ),
        compiler_params=pltpu.CompilerParams(
            dimension_semantics=("parallel",),
            vmem_limit_bytes=_vmem_limit_bytes(row_tile, E, io_bytes,
                                               weight_bytes, vmem_cap),
        ),
        cost_estimate=cost,
    )(
        x2d,
        prep["g1"], prep["b1"],
        prep["wa"], prep["ba"],
        prep["g2"], prep["b2"],
        prep["wfc_t"], prep["bfc"],
        prep["wpr_t"], prep["bpr"],
    )

    if n_pad != N:
        out2d = out2d[:N]
    return out2d.reshape(B, T, E).astype(x.dtype)


# -------------------- pure-JAX f32 reference (for verification) --------------------
def gpt2_block_reference(x, params):
    B, T, E = x.shape

    def ln(v, g, b):
        mu = jnp.mean(v, axis=-1, keepdims=True)
        var = jnp.mean((v - mu) ** 2, axis=-1, keepdims=True)
        return (v - mu) / jnp.sqrt(var + LN_EPS) * g + b

    h1 = ln(x, params["ln_1.weight"], params["ln_1.bias"])
    qkv = h1 @ params["attn.c_attn.weight"].T + params["attn.c_attn.bias"]
    v = qkv[..., 2 * E: 3 * E]            # SDPA output discarded in reference code
    attn_out = v @ params["attn.c_proj.weight"].T + params["attn.c_proj.bias"]
    x = x + attn_out

    h2 = ln(x, params["ln_2.weight"], params["ln_2.bias"])
    fc = h2 @ params["mlp.c_fc.weight"].T + params["mlp.c_fc.bias"]
    act = _gelu_tanh(fc)
    mlp_out = act @ params["mlp.c_proj.weight"].T + params["mlp.c_proj.bias"]
    return x + mlp_out


def init_params(key, n_embed):
    E = n_embed
    keys = jax.random.split(key, 8)
    scale = 0.02
    return {
        "ln_1.weight": jnp.ones((E,), jnp.float32),
        "ln_1.bias": jnp.zeros((E,), jnp.float32),
        "attn.c_attn.weight": scale * jax.random.normal(keys[0], (3 * E, E), jnp.float32),
        "attn.c_attn.bias": scale * jax.random.normal(keys[1], (3 * E,), jnp.float32),
        "attn.c_proj.weight": scale * jax.random.normal(keys[2], (E, E), jnp.float32),
        "attn.c_proj.bias": scale * jax.random.normal(keys[3], (E,), jnp.float32),
        "ln_2.weight": jnp.ones((E,), jnp.float32),
        "ln_2.bias": jnp.zeros((E,), jnp.float32),
        "mlp.c_fc.weight": scale * jax.random.normal(keys[4], (4 * E, E), jnp.float32),
        "mlp.c_fc.bias": scale * jax.random.normal(keys[5], (4 * E,), jnp.float32),
        "mlp.c_proj.weight": scale * jax.random.normal(keys[6], (E, 4 * E), jnp.float32),
        "mlp.c_proj.bias": scale * jax.random.normal(keys[7], (E,), jnp.float32),
    }


if __name__ == "__main__":
    # Small config, lane-dense embedding: n_embed=128, n_head=4, seq=8, batch=2.
    B, T, E = 2, 8, 128
    key = jax.random.PRNGKey(0)
    kx, kp = jax.random.split(key)
    x = jax.random.normal(kx, (B, T, E), jnp.float32)
    params = init_params(kp, E)

    prep = prepare_block_params(params, E)   # one-time transpose + attn fold + bf16 cast
    out = gpt2_block_forward(x, prep)
    out = jax.block_until_ready(out)

    ref = gpt2_block_reference(x, params)
    assert out.shape == (B, T, E)
    # bf16 weights + bf16 activation I/O at E=128 vs f32 reference -> loosened tol
    # (LN stats / residual adds / MXU accumulation stay f32).
    assert jnp.allclose(out, ref, atol=3e-2, rtol=3e-2), "mismatch vs reference"

    print("KERNEL_OK")
</pallas_src>

<mosaic_0001>
module attributes {stable_mosaic.version = 11 : i64} {
  func.func @block_kernel(%arg0: i32, %arg1: memref<16x128xbf16, #tpu.memory_space<vmem>>, %arg2: memref<1x128xf32, #tpu.memory_space<vmem>>, %arg3: memref<1x128xf32, #tpu.memory_space<vmem>>, %arg4: memref<128x128xbf16, #tpu.memory_space<vmem>>, %arg5: memref<1x128xf32, #tpu.memory_space<vmem>>, %arg6: memref<1x128xf32, #tpu.memory_space<vmem>>, %arg7: memref<1x128xf32, #tpu.memory_space<vmem>>, %arg8: memref<128x512xbf16, #tpu.memory_space<vmem>>, %arg9: memref<1x512xf32, #tpu.memory_space<vmem>>, %arg10: memref<512x128xbf16, #tpu.memory_space<vmem>>, %arg11: memref<1x128xf32, #tpu.memory_space<vmem>>, %arg12: memref<16x128xbf16, #tpu.memory_space<vmem>>) attributes {dimension_semantics = [#tpu.dimension_semantics<parallel>], iteration_bounds = array<i64: 1>, scalar_prefetch = 0 : i64, scratch_operands = 0 : i64, tpu.core_type = #tpu.core_type<tc>, window_params = [{transform_indices = @transform_0, window_bounds = array<i64: 16, 128>}, {pipeline_mode = #tpu.pipeline_mode<synchronous>, transform_indices = @transform_1, window_bounds = array<i64: 1, 128>}, {pipeline_mode = #tpu.pipeline_mode<synchronous>, transform_indices = @transform_2, window_bounds = array<i64: 1, 128>}, {pipeline_mode = #tpu.pipeline_mode<synchronous>, transform_indices = @transform_3, window_bounds = array<i64: 128, 128>}, {pipeline_mode = #tpu.pipeline_mode<synchronous>, transform_indices = @transform_4, window_bounds = array<i64: 1, 128>}, {pipeline_mode = #tpu.pipeline_mode<synchronous>, transform_indices = @transform_5, window_bounds = array<i64: 1, 128>}, {pipeline_mode = #tpu.pipeline_mode<synchronous>, transform_indices = @transform_6, window_bounds = array<i64: 1, 128>}, {pipeline_mode = #tpu.pipeline_mode<synchronous>, transform_indices = @transform_7, window_bounds = array<i64: 128, 512>}, {pipeline_mode = #tpu.pipeline_mode<synchronous>, transform_indices = @transform_8, window_bounds = array<i64: 1, 512>}, {pipeline_mode = #tpu.pipeline_mode<synchronous>, transform_indices = @transform_9, window_bounds = array<i64: 512, 128>}, {pipeline_mode = #tpu.pipeline_mode<synchronous>, transform_indices = @transform_10, window_bounds = array<i64: 1, 128>}, {transform_indices = @transform_11, window_bounds = array<i64: 16, 128>}]} {
    %c0 = arith.constant 0 : index
    %c0_0 = arith.constant 0 : index
    %0 = vector.load %arg1[%c0, %c0_0] : memref<16x128xbf16, #tpu.memory_space<vmem>>, vector<16x128xbf16>
    %1 = arith.extf %0 : vector<16x128xbf16> to vector<16x128xf32>
    %c0_1 = arith.constant 0 : index
    %c0_2 = arith.constant 0 : index
    %2 = vector.load %arg2[%c0_1, %c0_2] : memref<1x128xf32, #tpu.memory_space<vmem>>, vector<1x128xf32>
    %c0_3 = arith.constant 0 : index
    %c0_4 = arith.constant 0 : index
    %3 = vector.load %arg3[%c0_3, %c0_4] : memref<1x128xf32, #tpu.memory_space<vmem>>, vector<1x128xf32>
    %c0_5 = arith.constant 0 : index
    %c0_6 = arith.constant 0 : index
    %4 = vector.load %arg6[%c0_5, %c0_6] : memref<1x128xf32, #tpu.memory_space<vmem>>, vector<1x128xf32>
    %c0_7 = arith.constant 0 : index
    %c0_8 = arith.constant 0 : index
    %5 = vector.load %arg7[%c0_7, %c0_8] : memref<1x128xf32, #tpu.memory_space<vmem>>, vector<1x128xf32>
    %c0_9 = arith.constant 0 : index
    %c0_10 = arith.constant 0 : index
    %6 = vector.load %arg5[%c0_9, %c0_10] : memref<1x128xf32, #tpu.memory_space<vmem>>, vector<1x128xf32>
    %c0_11 = arith.constant 0 : index
    %c0_12 = arith.constant 0 : index
    %7 = vector.load %arg9[%c0_11, %c0_12] : memref<1x512xf32, #tpu.memory_space<vmem>>, vector<1x512xf32>
    %c0_13 = arith.constant 0 : index
    %c0_14 = arith.constant 0 : index
    %8 = vector.load %arg11[%c0_13, %c0_14] : memref<1x128xf32, #tpu.memory_space<vmem>>, vector<1x128xf32>
    %cst = arith.constant dense<0.000000e+00> : vector<16xf32>
    %9 = vector.multi_reduction <add>, %1, %cst [1] : vector<16x128xf32> to vector<16xf32>
    %10 = vector.shape_cast %9 : vector<16xf32> to vector<16x1xf32>
    %cst_15 = arith.constant 1.280000e+02 : f32
    %11 = vector.broadcast %cst_15 : f32 to vector<16x1xf32>
    %12 = arith.divf %10, %11 : vector<16x1xf32>
    %13 = vector.broadcast %12 : vector<16x1xf32> to vector<16x128xf32>
    %14 = arith.subf %1, %13 : vector<16x128xf32>
    %15 = arith.mulf %14, %14 : vector<16x128xf32>
    %cst_16 = arith.constant dense<0.000000e+00> : vector<16xf32>
    %16 = vector.multi_reduction <add>, %15, %cst_16 [1] : vector<16x128xf32> to vector<16xf32>
    %17 = vector.shape_cast %16 : vector<16xf32> to vector<16x1xf32>
    %cst_17 = arith.constant 1.280000e+02 : f32
    %18 = vector.broadcast %cst_17 : f32 to vector<16x1xf32>
    %19 = arith.divf %17, %18 : vector<16x1xf32>
    %cst_18 = arith.constant 9.99999974E-6 : f32
    %20 = vector.broadcast %cst_18 : f32 to vector<16x1xf32>
    %21 = arith.addf %19, %20 : vector<16x1xf32>
    %22 = math.rsqrt %21 : vector<16x1xf32>
    %23 = vector.broadcast %22 : vector<16x1xf32> to vector<16x128xf32>
    %24 = arith.mulf %14, %23 : vector<16x128xf32>
    %25 = vector.broadcast %2 : vector<1x128xf32> to vector<16x128xf32>
    %26 = arith.mulf %24, %25 : vector<16x128xf32>
    %27 = vector.broadcast %3 : vector<1x128xf32> to vector<16x128xf32>
    %28 = arith.addf %26, %27 : vector<16x128xf32>
    %29 = arith.truncf %28 : vector<16x128xf32> to vector<16x128xbf16>
    %c0_19 = arith.constant 0 : index
    %c0_20 = arith.constant 0 : index
    %30 = vector.load %arg4[%c0_19, %c0_20] : memref<128x128xbf16, #tpu.memory_space<vmem>>, vector<128x128xbf16>
    %cst_21 = arith.constant dense<0.000000e+00> : vector<16x128xf32>
    %31 = tpu.matmul %29, %30, %cst_21 {dimension_numbers = #tpu.dot_dimension_numbers<[1], [0], [0], [1], [0, 0, 1, 1], [], []>} : vector<16x128xbf16>, vector<128x128xbf16>, vector<16x128xf32> -> vector<16x128xf32>
    %32 = vector.broadcast %6 : vector<1x128xf32> to vector<16x128xf32>
    %33 = arith.addf %31, %32 : vector<16x128xf32>
    %34 = arith.addf %1, %33 : vector<16x128xf32>
    %cst_22 = arith.constant dense<0.000000e+00> : vector<16xf32>
    %35 = vector.multi_reduction <add>, %34, %cst_22 [1] : vector<16x128xf32> to vector<16xf32>
    %36 = vector.shape_cast %35 : vector<16xf32> to vector<16x1xf32>
    %cst_23 = arith.constant 1.280000e+02 : f32
    %37 = vector.broadcast %cst_23 : f32 to vector<16x1xf32>
    %38 = arith.divf %36, %37 : vector<16x1xf32>
    %39 = vector.broadcast %38 : vector<16x1xf32> to vector<16x128xf32>
    %40 = arith.subf %34, %39 : vector<16x128xf32>
    %41 = arith.mulf %40, %40 : vector<16x128xf32>
    %cst_24 = arith.constant dense<0.000000e+00> : vector<16xf32>
    %42 = vector.multi_reduction <add>, %41, %cst_24 [1] : vector<16x128xf32> to vector<16xf32>
    %43 = vector.shape_cast %42 : vector<16xf32> to vector<16x1xf32>
    %cst_25 = arith.constant 1.280000e+02 : f32
    %44 = vector.broadcast %cst_25 : f32 to vector<16x1xf32>
    %45 = arith.divf %43, %44 : vector<16x1xf32>
    %cst_26 = arith.constant 9.99999974E-6 : f32
    %46 = vector.broadcast %cst_26 : f32 to vector<16x1xf32>
    %47 = arith.addf %45, %46 : vector<16x1xf32>
    %48 = math.rsqrt %47 : vector<16x1xf32>
    %49 = vector.broadcast %48 : vector<16x1xf32> to vector<16x128xf32>
    %50 = arith.mulf %40, %49 : vector<16x128xf32>
    %51 = vector.broadcast %4 : vector<1x128xf32> to vector<16x128xf32>
    %52 = arith.mulf %50, %51 : vector<16x128xf32>
    %53 = vector.broadcast %5 : vector<1x128xf32> to vector<16x128xf32>
    %54 = arith.addf %52, %53 : vector<16x128xf32>
    %55 = arith.truncf %54 : vector<16x128xf32> to vector<16x128xbf16>
    %c0_27 = arith.constant 0 : index
    %c0_28 = arith.constant 0 : index
    %56 = vector.load %arg8[%c0_27, %c0_28] : memref<128x512xbf16, #tpu.memory_space<vmem>>, vector<128x512xbf16>
    %cst_29 = arith.constant dense<0.000000e+00> : vector<16x512xf32>
    %57 = tpu.matmul %55, %56, %cst_29 {dimension_numbers = #tpu.dot_dimension_numbers<[1], [0], [0], [1], [0, 0, 1, 1], [], []>} : vector<16x128xbf16>, vector<128x512xbf16>, vector<16x512xf32> -> vector<16x512xf32>
    %58 = vector.broadcast %7 : vector<1x512xf32> to vector<16x512xf32>
    %59 = arith.addf %57, %58 : vector<16x512xf32>
    %cst_30 = arith.constant 5.000000e-01 : f32
    %60 = vector.broadcast %cst_30 : f32 to vector<16x512xf32>
    %61 = arith.mulf %60, %59 : vector<16x512xf32>
    %cst_31 = arith.constant 4.471500e-02 : f32
    %62 = vector.broadcast %cst_31 : f32 to vector<16x512xf32>
    %63 = arith.mulf %62, %59 : vector<16x512xf32>
    %64 = arith.mulf %63, %59 : vector<16x512xf32>
    %65 = arith.mulf %64, %59 : vector<16x512xf32>
    %66 = arith.addf %59, %65 : vector<16x512xf32>
    %cst_32 = arith.constant 0.797884583 : f32
    %67 = vector.broadcast %cst_32 : f32 to vector<16x512xf32>
    %68 = arith.mulf %67, %66 : vector<16x512xf32>
    %69 = math.tanh %68 : vector<16x512xf32>
    %cst_33 = arith.constant 1.000000e+00 : f32
    %70 = vector.broadcast %cst_33 : f32 to vector<16x512xf32>
    %71 = arith.addf %70, %69 : vector<16x512xf32>
    %72 = arith.mulf %61, %71 : vector<16x512xf32>
    %73 = arith.truncf %72 : vector<16x512xf32> to vector<16x512xbf16>
    %c0_34 = arith.constant 0 : index
    %c0_35 = arith.constant 0 : index
    %74 = vector.load %arg10[%c0_34, %c0_35] : memref<512x128xbf16, #tpu.memory_space<vmem>>, vector<512x128xbf16>
    %cst_36 = arith.constant dense<0.000000e+00> : vector<16x128xf32>
    %75 = tpu.matmul %73, %74, %cst_36 {dimension_numbers = #tpu.dot_dimension_numbers<[1], [0], [0], [1], [0, 0, 1, 1], [], []>} : vector<16x512xbf16>, vector<512x128xbf16>, vector<16x128xf32> -> vector<16x128xf32>
    %76 = vector.broadcast %8 : vector<1x128xf32> to vector<16x128xf32>
    %77 = arith.addf %75, %76 : vector<16x128xf32>
    %78 = arith.addf %34, %77 : vector<16x128xf32>
    %79 = arith.truncf %78 : vector<16x128xf32> to vector<16x128xbf16>
    %c0_37 = arith.constant 0 : index
    %c0_38 = arith.constant 0 : index
    %80 = vector.load %arg12[%c0_37, %c0_38] : memref<16x128xbf16, #tpu.memory_space<vmem>>, vector<16x128xbf16>
    tpu.vector_store %arg12[%c0_37, %c0_38], %79 {strides = array<i32>} : memref<16x128xbf16, #tpu.memory_space<vmem>>, vector<16x128xbf16>,
    return
  }
  func.func @transform_0(%arg0: i32) -> (i32, i32) {
    %c0_i32 = arith.constant 0 : i32
    %c0_i32_0 = arith.constant 0 : i32
    return %arg0, %c0_i32 : i32, i32
  }
  func.func @transform_1(%arg0: i32) -> (i32, i32) {
    %c0_i32 = arith.constant 0 : i32
    %c0_i32_0 = arith.constant 0 : i32
    %c0_i32_1 = arith.constant 0 : i32
    return %c0_i32, %c0_i32_0 : i32, i32
  }
  func.func @transform_2(%arg0: i32) -> (i32, i32) {
    %c0_i32 = arith.constant 0 : i32
    %c0_i32_0 = arith.constant 0 : i32
    %c0_i32_1 = arith.constant 0 : i32
    return %c0_i32, %c0_i32_0 : i32, i32
  }
  func.func @transform_3(%arg0: i32) -> (i32, i32) {
    %c0_i32 = arith.constant 0 : i32
    %c0_i32_0 = arith.constant 0 : i32
    %c0_i32_1 = arith.constant 0 : i32
    return %c0_i32, %c0_i32_0 : i32, i32
  }
  func.func @transform_4(%arg0: i32) -> (i32, i32) {
    %c0_i32 = arith.constant 0 : i32
    %c0_i32_0 = arith.constant 0 : i32
    %c0_i32_1 = arith.constant 0 : i32
    return %c0_i32, %c0_i32_0 : i32, i32
  }
  func.func @transform_5(%arg0: i32) -> (i32, i32) {
    %c0_i32 = arith.constant 0 : i32
    %c0_i32_0 = arith.constant 0 : i32
    %c0_i32_1 = arith.constant 0 : i32
    return %c0_i32, %c0_i32_0 : i32, i32
  }
  func.func @transform_6(%arg0: i32) -> (i32, i32) {
    %c0_i32 = arith.constant 0 : i32
    %c0_i32_0 = arith.constant 0 : i32
    %c0_i32_1 = arith.constant 0 : i32
    return %c0_i32, %c0_i32_0 : i32, i32
  }
  func.func @transform_7(%arg0: i32) -> (i32, i32) {
    %c0_i32 = arith.constant 0 : i32
    %c0_i32_0 = arith.constant 0 : i32
    %c0_i32_1 = arith.constant 0 : i32
    return %c0_i32, %c0_i32_0 : i32, i32
  }
  func.func @transform_8(%arg0: i32) -> (i32, i32) {
    %c0_i32 = arith.constant 0 : i32
    %c0_i32_0 = arith.constant 0 : i32
    %c0_i32_1 = arith.constant 0 : i32
    return %c0_i32, %c0_i32_0 : i32, i32
  }
  func.func @transform_9(%arg0: i32) -> (i32, i32) {
    %c0_i32 = arith.constant 0 : i32
    %c0_i32_0 = arith.constant 0 : i32
    %c0_i32_1 = arith.constant 0 : i32
    return %c0_i32, %c0_i32_0 : i32, i32
  }
  func.func @transform_10(%arg0: i32) -> (i32, i32) {
    %c0_i32 = arith.constant 0 : i32
    %c0_i32_0 = arith.constant 0 : i32
    %c0_i32_1 = arith.constant 0 : i32
    return %c0_i32, %c0_i32_0 : i32, i32
  }
  func.func @transform_11(%arg0: i32) -> (i32, i32) {
    %c0_i32 = arith.constant 0 : i32
    %c0_i32_0 = arith.constant 0 : i32
    return %arg0, %c0_i32 : i32, i32
  }
}

</mosaic_0001>

<bundles_post_ra>
// kernel: tpu_custom_call.1
= control target key start
LH: loop header
LB: loop body
LE: loop exit
PB: predicated region body
PF: predicated region fallthrough
CT: control target
= control target key end

     0   :  { %16 = vsyncpa [#allocation3], 0  ;;  %s1698_s0 = inlined_call_operand.hbm [shape: bf16[16,128], index: 0, kind: input, shape index: {}]   ;;  %s1699_s1 = inlined_call_operand.vmem [shape: f32[1,128], index: 1, kind: input, shape index: {}]   ;;  %s1700_s2 = inlined_call_operand.vmem [shape: f32[1,128], index: 2, kind: input, shape index: {}]   ;;  %s1701_s3 = inlined_call_operand.hbm [shape: bf16[128,128], index: 3, kind: input, shape index: {}]   ;;  %s1702_s4 = inlined_call_operand.vmem [shape: f32[1,128], index: 4, kind: input, shape index: {}]   ;;  %s1703_s5 = inlined_call_operand.vmem [shape: f32[1,128], index: 5, kind: input, shape index: {}]   ;;  %s1704_s6 = inlined_call_operand.vmem [shape: f32[1,128], index: 6, kind: input, shape index: {}]   ;;  %s1705_s7 = inlined_call_operand.hbm [shape: bf16[128,512], index: 7, kind: input, shape index: {}]   ;;  %s1706_s8 = inlined_call_operand.vmem [shape: f32[1,512], index: 8, kind: input, shape index: {}]   ;;  %s1707_s9 = inlined_call_operand.hbm [shape: bf16[512,128], index: 9, kind: input, shape index: {}]   ;;  %s1708_s10 = inlined_call_operand.vmem [shape: f32[1,128], index: 10, kind: input, shape index: {}]   ;;  %s1709_s11 = inlined_call_operand.hbm [shape: bf16[16,128], index: 11, kind: output, shape index: {}]  }
   0x1   :  { %17 = vsyncpa [#allocation6], 0 }
   0x2   :  { %18 = vsyncpa [#allocation9], 0 }
   0x3   :  { %19 = vsyncpa [#allocation4], 0  ;;  %s1454_s17 = smov [#allocation5]   ;;  %s1455_s19 = smov [#allocation2]  }
   0x4   :  { %s41_s18 = sshll.u32 %s1454_s17, 4  ;;  %s25_s20 = sshll.u32 %s1455_s19, 4  ;;  %s42_s18 = int_to_ptr.vmem [resolvable:$true] %s41_s18  ;;  %s1526_s20 = int_to_ptr.vmem [resolvable:$true] %s25_s20 }
   0x5   :  { %s1336_s23 = scalar_lea.hbm %s1701_s3, 1024 }
   0x6   :  { %p1337_p0 = scmp.ne.s32.totalorder %s1701_s3, %s1336_s23  ;;  %p1340_p1 = scmp.lt.u32.totalorder %s1336_s23, %s1701_s3 }
   0x8   :  { %p1342_p2 = pnand %p1340_p1, %p1337_p0 }
   0xa   :  { %1345 = shalt.err (!%p1342_p2)
}
   0xb   :  { %s1346_s28 = scalar_lea.vmem %s42_s18, 1024  ;;  %p1351_p4 = scmp.lt.s32.totalorder %s42_s18, %s42_s18 }
   0xc   :  { %p1347_p3 = scmp.ne.s32.totalorder %s42_s18, %s1346_s28  ;;  %p1352_p5 = scmp.lt.s32.totalorder %s1346_s28, %s1346_s28 }
   0xe   :  { %p1353_p6 = por %p1352_p5, %p1351_p4 }
  0x10   :  { %p1354_p7 = pnand %p1353_p6, %p1347_p3 }
  0x12   :  { %1357 = shalt.err (!%p1354_p7)
}
  0x13   :  { %s1456_s29 = smov 64   ;;  %s1457_s30 = smov 4  }
  0x14   :  { %47 = dma.hbm_to_vmem [thread:$0]  %s1701_s3, 1024, %s42_s18, [#allocation6], %s1456_s29, %s1456_s29, %s1457_s30  }
  0x15   :  { %s1358_s16 = scalar_lea.hbm %s1698_s0, 128 }
  0x16   :  { %p1359_p8 = scmp.ne.s32.totalorder %s1698_s0, %s1358_s16  ;;  %p1362_p9 = scmp.lt.u32.totalorder %s1358_s16, %s1698_s0 }
  0x18   :  { %p1364_p10 = pnand %p1362_p9, %p1359_p8 }
  0x1a   :  { %1367 = shalt.err (!%p1364_p10)
}
  0x1b   :  { %s1368_s23 = scalar_lea.vmem %s1526_s20, 128  ;;  %p1373_p12 = scmp.lt.s32.totalorder %s1526_s20, %s1526_s20 }
  0x1c   :  { %p1369_p11 = scmp.ne.s32.totalorder %s1526_s20, %s1368_s23  ;;  %p1374_p13 = scmp.lt.s32.totalorder %s1368_s23, %s1368_s23 }
  0x1e   :  { %p1375_p0 = por %p1374_p13, %p1373_p12 }
  0x20   :  { %p1376_p1 = pnand %p1375_p0, %p1369_p11 }
  0x22   :  { %1379 = shalt.err (!%p1376_p1)
}
  0x23   :  { %31 = dma.hbm_to_vmem [thread:$0]  %s1698_s0, 128, %s1526_s20, [#allocation3], %s1456_s29, %s1456_s29, %s1457_s30  }
  0x24   :  { %s1458_s24 = smov [#allocation7]   ;;  %s1380_s28 = scalar_lea.hbm %s1705_s7, 4096 }
  0x25   :  { %s59_s25 = sshll.u32 %s1458_s24, 4  ;;  %p1381_p2 = scmp.ne.s32.totalorder %s1705_s7, %s1380_s28  ;;  %s60_s25 = int_to_ptr.vmem [resolvable:$true] %s59_s25 }
  0x26   :  { %p1384_p3 = scmp.lt.u32.totalorder %s1380_s28, %s1705_s7 }
  0x28   :  { %p1386_p4 = pnand %p1384_p3, %p1381_p2 }
  0x2a   :  { %1389 = shalt.err (!%p1386_p4)
}
  0x2b   :  { %s1390_s16 = scalar_lea.vmem %s60_s25, 4096  ;;  %p1395_p6 = scmp.lt.s32.totalorder %s60_s25, %s60_s25 }
  0x2c   :  { %p1391_p5 = scmp.ne.s32.totalorder %s60_s25, %s1390_s16  ;;  %p1396_p7 = scmp.lt.s32.totalorder %s1390_s16, %s1390_s16 }
  0x2e   :  { %p1397_p8 = por %p1396_p7, %p1395_p6 }
  0x30   :  { %p1398_p9 = pnand %p1397_p8, %p1391_p5 }
  0x32   :  { %1401 = shalt.err (!%p1398_p9)
}
  0x33   :  { %s1459_s0 = smov 256   ;;  %s1460_s20 = smov 16  }
  0x34   :  { %65 = dma.hbm_to_vmem [thread:$0]  %s1705_s7, 4096, %s60_s25, [#allocation6], %s1459_s0, %s1459_s0, %s1460_s20  }
  0x35   :  { %s1461_s21 = smov [#allocation8]   ;;  %s1402_s18 = scalar_lea.hbm %s1707_s9, 4096 }
  0x36   :  { %s73_s22 = sshll.u32 %s1461_s21, 4  ;;  %p1403_p10 = scmp.ne.s32.totalorder %s1707_s9, %s1402_s18  ;;  %s74_s22 = int_to_ptr.vmem [resolvable:$true] %s73_s22 }
  0x37   :  { %p1406_p11 = scmp.lt.u32.totalorder %s1402_s18, %s1707_s9 }
  0x39   :  { %p1408_p12 = pnand %p1406_p11, %p1403_p10 }
  0x3b   :  { %1411 = shalt.err (!%p1408_p12)
}
  0x3c   :  { %s1412_s12 = scalar_lea.vmem %s74_s22, 4096  ;;  %p1417_p0 = scmp.lt.s32.totalorder %s74_s22, %s74_s22 }
  0x3d   :  { %p1413_p13 = scmp.ne.s32.totalorder %s74_s22, %s1412_s12  ;;  %p1418_p1 = scmp.lt.s32.totalorder %s1412_s12, %s1412_s12 }
  0x3f   :  { %p1419_p2 = por %p1418_p1, %p1417_p0 }
  0x41   :  { %p1420_p3 = pnand %p1419_p2, %p1413_p13 }
  0x43   :  { %1423 = shalt.err (!%p1420_p3)
}
  0x44   :  { %79 = dma.hbm_to_vmem [thread:$0]  %s1707_s9, 4096, %s74_s22, [#allocation9], %s1456_s29, %s1456_s29, %s1457_s30  }
  0x45   :  { %1446 = dma.done.wait [#allocation3], 128  }
  0x46   :  { %1447 = vsyncadd [#allocation3], 4294967168 }
  0x47   :  { %1448 = dma.done.wait [#allocation6], 5120  }
  0x48   :  { %1449 = vsyncadd [#allocation6], 4294962176 }
  0x49   :  { %1450 = dma.done.wait [#allocation9], 4096  }
  0x4a   :  { %1451 = vsyncadd [#allocation9], 4294963200  ;;  %v1131_v0 = vld [vmem:[#allocation2] sm:$0xff]   ;;  %v1224_v3 = vld [vmem:[#allocation5] sm:$0xff]   ;;  %v1462_v4 = vmov 0.0   ;;  %vm1463_vm0 = vmmov 0  }
  0x4b   :  { %v1590_v1 = vunpack.c.l.bf16 %v1131_v0  ;;  %v1593_v2 = vunpack.c.h.bf16 %v1131_v0  ;;  %1192 = vmatprep.subr.bf16.mxu0 %v1462_v4  ;;  %v1225_v13 = vld [vmem:[#allocation5 + $0x8] sm:$0xff]   ;;  %v1226_v14 = vld [vmem:[#allocation5 + $0x10] sm:$0xff]   ;;  %v1227_v15 = vld [vmem:[#allocation5 + $0x18] sm:$0xff]   ;;  %1208 = vmatprep.mubr.msk.bf16.mxu0 %vm1463_vm0, %v1462_v4  ;;  %s1465_s19 = smov [#allocation10]  }
  0x4c   :  { %1193 = vmatpush3.bf16.msra.mxu0 %v1224_v3  ;;  %v1228_v16 = vld [vmem:[#allocation5 + $0x20] sm:$0xff]   ;;  %v1229_v17 = vld [vmem:[#allocation5 + $0x28] sm:$0xff]   ;;  %v1230_v18 = vld [vmem:[#allocation5 + $0x30] sm:$0xff]   ;;  %s1034_s21 = sshll.u32 %s1465_s19, 4  ;;  %s1035_s21 = int_to_ptr.vmem [resolvable:$true] %s1034_s21 }
  0x4d   :  { %106 = vadd.xlane.f32.xlu0 %v1590_v1  ;;  %1194 = vmatprep.subr.bf16.mxu0 %v1462_v4  ;;  %v1231_v19 = vld [vmem:[#allocation5 + $0x38] sm:$0xff]   ;;  %v1232_v46 = vld [vmem:[#allocation7 + $0x4] ss:$16 sps:$4 sm:$0xff]   ;;  %v1237_v49 = vld [vmem:[#allocation7] ss:$16 sps:$4 sm:$0xff]   ;;  %p1429_p5 = scmp.lt.s32.totalorder %s1035_s21, %s1035_s21 }
  0x4e   :  { %v1048_v28 = vld [vmem:[%s1699_s1] ss:$0 sm:$0xff]  ;;  %v1236_v48 = vld [vmem:[#allocation7 + $0xc] ss:$16 sps:$4 sm:$0xff]   ;;  %v1238_v50 = vld [vmem:[#allocation7 + $0x24] ss:$16 sps:$4 sm:$0xff]   ;;  %511 = vmatprep.subr.bf16.mxu1 %v1232_v46 }
  0x4f   :  { %v1049_v32 = vld [vmem:[%s1700_s2] ss:$0 sm:$0xff]  ;;  %v1242_v51 = vld [vmem:[#allocation7 + $0x2c] ss:$16 sps:$4 sm:$0xff]   ;;  %512 = vmatpush1.bf16.msra.mxu1 %v1237_v49  ;;  %v1243_v53 = vld [vmem:[#allocation7 + $0x20] ss:$16 sps:$4 sm:$0xff]  }
  0x50   :  { %1195 = vmatpush3.bf16.msra.mxu0 %v1225_v13  ;;  %v1050_v37 = vld [vmem:[%s1702_s4] ss:$0 sm:$0xff]  ;;  %513 = vmatprep.subr.bf16.mxu1 %v1238_v50  ;;  %v1244_v62 = vld [vmem:[#allocation7 + $0x44] ss:$16 sps:$4 sm:$0xff]   ;;  %v1248_v63 = vld [vmem:[#allocation7 + $0x4c] ss:$16 sps:$4 sm:$0xff]  }
  0x51   :  { %108 = vadd.xlane.f32.xlu0 %v1593_v2  ;;  %1196 = vmatprep.subr.bf16.mxu0 %v1462_v4  ;;  %v1234_v47 = vld [vmem:[#allocation7 + $0x8] ss:$16 sps:$4 sm:$0xff]   ;;  %v1254_v3 = vld [vmem:[#allocation7 + $0x6c] ss:$16 sps:$4 sm:$0xff]   ;;  %v1267_v13 = vld [vmem:[#allocation7 + $0xa0] ss:$16 sps:$4 sm:$0xff]  }
  0x52   :  { %v1240_v52 = vld [vmem:[#allocation7 + $0x28] ss:$16 sps:$4 sm:$0xff]   ;;  %v1288_v50 = vld [vmem:[#allocation8 + $0x50] sm:$0xff]  }
  0x53   :  { %514 = vmatpush1.bf16.msra.mxu1 %v1243_v53  ;;  %v1246_v0 = vld [vmem:[#allocation7 + $0x48] ss:$16 sps:$4 sm:$0xff]   ;;  %v1291_v53 = vld [vmem:[#allocation8 + $0x90] sm:$0xff]  }
  0x54   :  { %1197 = vmatpush3.bf16.msra.mxu0 %v1226_v14  ;;  %515 = vmatprep.subr.bf16.mxu1 %v1244_v62  ;;  %v1268_v14 = vld [vmem:[#allocation7 + $0xc4] ss:$16 sps:$4 sm:$0xff]   ;;  %v1284_v46 = vld [vmem:[#allocation8 + $0x48] sm:$0xff]  }
  0x55   :  { %1198 = vmatprep.subr.bf16.mxu0 %v1462_v4  ;;  %v1287_v49 = vld [vmem:[#allocation8 + $0x88] sm:$0xff]  }
  0x56   :  { %v1300_v62 = vld [vmem:[#allocation8 + $0x68] sm:$0xff]  }
  0x58   :  { %1199 = vmatpush3.bf16.msra.mxu0 %v1227_v15  ;;  %v1272_v15 = vld [vmem:[#allocation7 + $0xcc] ss:$16 sps:$4 sm:$0xff]  }
  0x59   :  { %1200 = vmatprep.subr.bf16.mxu0 %v1462_v4 }
  0x5c   :  { %1201 = vmatpush3.bf16.msra.mxu0 %v1228_v16  ;;  %v1464_v16 = vmov 0  }
  0x5d   :  { %1202 = vmatprep.subr.bf16.mxu0 %v1462_v4  ;;  %543 = vmatprep.mubr.bf16.mxu1 %v1464_v16 }
  0x60   :  { %1203 = vmatpush3.bf16.msra.mxu0 %v1229_v17  ;;  %v1270_v17 = vld [vmem:[#allocation7 + $0xc8] ss:$16 sps:$4 sm:$0xff]  }
  0x61   :  { %1204 = vmatprep.subr.bf16.mxu0 %v1462_v4 }
  0x64   :  { %1205 = vmatpush3.bf16.msra.mxu0 %v1230_v18  ;;  %v1273_v18 = vld [vmem:[#allocation7 + $0xc0] ss:$16 sps:$4 sm:$0xff]  }
  0x65   :  { %1206 = vmatprep.subr.bf16.mxu0 %v1462_v4  ;;  %v1252_v4 = vld [vmem:[#allocation7 + $0x68] ss:$16 sps:$4 sm:$0xff]  }
  0x68   :  { %1207 = vmatpush3.bf16.msra.mxu0 %v1231_v19  ;;  %v1274_v19 = vld [vmem:[#allocation7 + $0xe4] ss:$16 sps:$4 sm:$0xff]  }
  0x69   :  { %554 = vmatprep.subr.bf16.mxu0 %v1236_v48  ;;  %v1286_v48 = vld [vmem:[#allocation8 + $0x8] sm:$0xff]  }
  0xda   :  { %v107_v5 = vpop.xlane.xlu0 %106 }
  0xdb   :  { %v111_v6 = vmul.f32 0.0078125, %v107_v5  ;;  %v1255_v5 = vld [vmem:[#allocation7 + $0x60] ss:$16 sps:$4 sm:$0xff]  }
  0xdd   :  { %v113_v7 = vsub.f32 %v1590_v1, %v111_v6  ;;  %v1256_v6 = vld [vmem:[#allocation7 + $0x84] ss:$16 sps:$4 sm:$0xff]  }
  0xde   :  { %v109_v8 = vpop.xlane.xlu0 %108 }
  0xdf   :  { %v112_v9 = vmul.f32 0.0078125, %v109_v8  ;;  %v115_v10 = vmul.f32 %v113_v7, %v113_v7  ;;  %v1260_v8 = vld [vmem:[#allocation7 + $0x8c] ss:$16 sps:$4 sm:$0xff]  }
  0xe1   :  { %v114_v11 = vsub.f32 %v1593_v2, %v112_v9  ;;  %117 = vadd.xlane.f32.xlu1 %v115_v10  ;;  %v1261_v9 = vld [vmem:[#allocation7 + $0x80] ss:$16 sps:$4 sm:$0xff]   ;;  %v1262_v10 = vld [vmem:[#allocation7 + $0xa4] ss:$16 sps:$4 sm:$0xff]  }
  0xe3   :  { %v116_v12 = vmul.f32 %v114_v11, %v114_v11 }
  0xe5   :  { %119 = vadd.xlane.f32.xlu1 %v116_v12  ;;  %v1264_v12 = vld [vmem:[#allocation7 + $0xa8] ss:$16 sps:$4 sm:$0xff]  }
 0x16e   :  { %v118_v20 = vpop.xlane.xlu1 %117 }
 0x16f   :  { %v121_v21 = vmul.f32 0.0078125, %v118_v20  ;;  %v1278_v20 = vld [vmem:[#allocation7 + $0xec] ss:$16 sps:$4 sm:$0xff]  }
 0x171   :  { %v123_v22 = vadd.f32 1e-05, %v121_v21  ;;  %v1276_v21 = vld [vmem:[#allocation7 + $0xe8] ss:$16 sps:$4 sm:$0xff]  }
 0x172   :  { %v120_v23 = vpop.xlane.xlu1 %119 }
 0x173   :  { %1312 = vrsqrt.f32 %v123_v22  ;;  %v122_v24 = vmul.f32 0.0078125, %v120_v23  ;;  %v1279_v22 = vld [vmem:[#allocation7 + $0xe0] ss:$16 sps:$4 sm:$0xff]  }
 0x175   :  { %v124_v25 = vadd.f32 1e-05, %v122_v24 }
 0x177   :  { %1314 = vrsqrt.f32 %v124_v25 }
 0x17d   :  { %v1313_v26 = vpop.eup %1312 }
 0x17e   :  { %v127_v27 = vmul.f32 %v1313_v26, %v113_v7  ;;  %v1258_v7 = vld [vmem:[#allocation7 + $0x88] ss:$16 sps:$4 sm:$0xff]  }
 0x180   :  { %v135_v31 = vmul.f32 %v1048_v28, %v127_v27 }
 0x181   :  { %v1315_v29 = vpop.eup %1314 }
 0x182   :  { %v128_v30 = vmul.f32 %v1315_v29, %v114_v11  ;;  %v143_v34 = vadd.f32 %v1049_v32, %v135_v31  ;;  %v1266_v11 = vld [vmem:[#allocation7 + $0xac] ss:$16 sps:$4 sm:$0xff]  }
 0x184   :  { %v136_v33 = vmul.f32 %v1048_v28, %v128_v30  ;;  %v1059_v30 = vld [vmem:[%s1703_s5] ss:$0 sm:$0xff] }
 0x186   :  { %v144_v35 = vadd.f32 %v1049_v32, %v136_v33 }
 0x188   :  { %v145_v36 = vpack.c.bf16 %v144_v35, %v143_v34  ;;  %v1060_v35 = vld [vmem:[%s1704_s6] ss:$0 sm:$0xff] }
 0x18a   :  { %1209 = vmatmul.mubr.bf16.vlgmr.msra.gmra.mrb[0].mxu0 %v145_v36 }
 0x18b   :  { %555 = vmatpush1.bf16.msra.mxu0 %v1234_v47  ;;  %586 = vmatprep.mubr.bf16.mxu0 %v1464_v16  ;;  %v1285_v47 = vld [vmem:[#allocation8 + $0xc8] sm:$0xff]  }
 0x18c   :  { %556 = vmatprep.subr.bf16.mxu0 %v1242_v51  ;;  %v1289_v51 = vld [vmem:[#allocation8 + $0xd0] sm:$0xff]  }
 0x18f   :  { %557 = vmatpush1.bf16.msra.mxu0 %v1240_v52  ;;  %v1290_v52 = vld [vmem:[#allocation8 + $0x10] sm:$0xff]  }
 0x190   :  { %558 = vmatprep.subr.bf16.mxu0 %v1248_v63  ;;  %v1301_v63 = vld [vmem:[#allocation8 + $0xe8] sm:$0xff]  }
 0x193   :  { %559 = vmatpush1.bf16.msra.mxu0 %v1246_v0  ;;  %v1302_v0 = vld [vmem:[#allocation8 + $0x28] sm:$0xff]  }
 0x194   :  { %560 = vmatprep.subr.bf16.mxu0 %v1254_v3  ;;  %v1305_v3 = vld [vmem:[#allocation8 + $0xf0] sm:$0xff]  }
 0x197   :  { %561 = vmatpush1.bf16.msra.mxu0 %v1252_v4  ;;  %v1306_v4 = vld [vmem:[#allocation8 + $0x30] sm:$0xff]  }
 0x198   :  { %562 = vmatprep.subr.bf16.mxu0 %v1260_v8  ;;  %v1310_v8 = vld [vmem:[#allocation8 + $0x38] sm:$0xff]  }
 0x19b   :  { %563 = vmatpush1.bf16.msra.mxu0 %v1258_v7  ;;  %v1309_v7 = vld [vmem:[#allocation8 + $0xf8] sm:$0xff]  }
 0x19c   :  { %564 = vmatprep.subr.bf16.mxu0 %v1266_v11 }
 0x19f   :  { %565 = vmatpush1.bf16.msra.mxu0 %v1264_v12 }
 0x1a0   :  { %566 = vmatprep.subr.bf16.mxu0 %v1272_v15 }
 0x1a3   :  { %567 = vmatpush1.bf16.msra.mxu0 %v1270_v17 }
 0x1a4   :  { %568 = vmatprep.subr.bf16.mxu0 %v1278_v20 }
 0x1a7   :  { %569 = vmatpush1.bf16.msra.mxu0 %v1276_v21 }
 0x25d   :  { %v250_v38 = vpop.f32.mrb[0].mxu0 }
 0x25e   :  { %v251_v39 = vadd.f32 %v1050_v37, %v250_v38  ;;  %v1210_v40 = vpop.f32.mrb[1].mxu0 }
 0x25f   :  { %v253_v41 = vpop.f32.mrb[2].mxu0  ;;  %v1280_v40 = vld [vmem:[#allocation8 + $0x40] sm:$0xff]  }
 0x260   :  { %v1608_v42 = vadd.f32 %v1590_v1, %v251_v39  ;;  %v254_v43 = vadd.f32 %v1050_v37, %v253_v41  ;;  %v1211_v44 = vpop.f32.mrb[3].mxu0  ;;  %v1249_v1 = vld [vmem:[#allocation7 + $0x40] ss:$16 sps:$4 sm:$0xff]  }
 0x261   :  { %516 = vmatpush1.bf16.msra.mxu1 %v1249_v1  ;;  %v1281_v41 = vld [vmem:[#allocation8 + $0xc0] sm:$0xff]   ;;  %v1303_v1 = vld [vmem:[#allocation8 + $0xa8] sm:$0xff]  }
 0x262   :  { %v1611_v45 = vadd.f32 %v1593_v2, %v254_v43  ;;  %259 = vadd.xlane.f32.xlu0 %v1608_v42  ;;  %v1250_v2 = vld [vmem:[#allocation7 + $0x64] ss:$16 sps:$4 sm:$0xff]   ;;  %1170 = vmatprep.subr.bf16.mxu0 %v1281_v41 }
 0x263   :  { %517 = vmatprep.subr.bf16.mxu1 %v1250_v2  ;;  %v1282_v43 = vld [vmem:[#allocation8] sm:$0xff]   ;;  %v1304_v2 = vld [vmem:[#allocation8 + $0x70] sm:$0xff]  }
 0x264   :  { %261 = vadd.xlane.f32.xlu1 %v1611_v45  ;;  %v1283_v44 = vld [vmem:[#allocation8 + $0x80] sm:$0xff]  }
 0x265   :  { %518 = vmatpush1.bf16.msra.mxu1 %v1255_v5  ;;  %v1307_v5 = vld [vmem:[#allocation8 + $0xb0] sm:$0xff]  }
 0x266   :  { %519 = vmatprep.subr.bf16.mxu1 %v1256_v6  ;;  %v1308_v6 = vld [vmem:[#allocation8 + $0x78] sm:$0xff]  }
 0x269   :  { %520 = vmatpush1.bf16.msra.mxu1 %v1261_v9  ;;  %v1311_v9 = vld [vmem:[#allocation8 + $0xb8] sm:$0xff]  }
 0x26a   :  { %521 = vmatprep.subr.bf16.mxu1 %v1262_v10  ;;  %v331_v10 = vlaneseq }
 0x26c   :  { %v332_v11 = vshrl.u32 %v331_v10, 7 }
 0x26d   :  { %522 = vmatpush1.bf16.msra.mxu1 %v1267_v13 }
 0x26e   :  { %523 = vmatprep.subr.bf16.mxu1 %v1268_v14  ;;  %v333_v12 = vsub.s32 0, %v332_v11  ;;  %v341_v13 = vsub.s32 2, %v332_v11  ;;  %v104_v14 = vld [vmem:[%s1706_s8] sm:$0xf]  ;;  %v337_v15 = vsub.s32 1, %v332_v11  ;;  %v345_v16 = vsub.s32 3, %v332_v11 }
 0x270   :  { %v334_v17 = vrot.slane %v104_v14, %v333_v12  ;;  %v346_v20 = vrot.slane %v104_v14, %v345_v16 }
 0x271   :  { %524 = vmatpush1.bf16.msra.mxu1 %v1273_v18  ;;  %v342_v18 = vrot.slane %v104_v14, %v341_v13 }
 0x272   :  { %525 = vmatprep.subr.bf16.mxu1 %v1274_v19  ;;  %v338_v19 = vrot.slane %v104_v14, %v337_v15 }
 0x275   :  { %526 = vmatpush1.bf16.msra.mxu1 %v1279_v22 }
 0x276   :  { %1148 = vmatprep.subr.bf16.mxu1 %v1280_v40 }
 0x2ef   :  { %v260_v54 = vpop.xlane.xlu0 %259 }
 0x2f0   :  { %v263_v55 = vmul.f32 0.0078125, %v260_v54  ;;  %v1292_v54 = vld [vmem:[#allocation8 + $0x58] sm:$0xff]  }
 0x2f1   :  { %v262_v56 = vpop.xlane.xlu1 %261 }
 0x2f2   :  { %v1616_v57 = vsub.f32 %v1608_v42, %v263_v55  ;;  %v264_v58 = vmul.f32 0.0078125, %v262_v56  ;;  %v1293_v55 = vld [vmem:[#allocation8 + $0xd8] sm:$0xff]  }
 0x2f3   :  { %v1294_v56 = vld [vmem:[#allocation8 + $0x18] sm:$0xff]  }
 0x2f4   :  { %v1619_v59 = vsub.f32 %v1611_v45, %v264_v58  ;;  %v267_v60 = vmul.f32 %v1616_v57, %v1616_v57  ;;  %v1296_v58 = vld [vmem:[#allocation8 + $0x60] sm:$0xff]  }
 0x2f6   :  { %269 = vadd.xlane.f32.xlu0 %v267_v60  ;;  %v268_v61 = vmul.f32 %v1619_v59, %v1619_v59  ;;  %v1298_v60 = vld [vmem:[#allocation8 + $0x20] sm:$0xff]  }
 0x2f8   :  { %271 = vadd.xlane.f32.xlu1 %v268_v61  ;;  %v1299_v61 = vld [vmem:[#allocation8 + $0xa0] sm:$0xff]  }
 0x383   :  { %v270_v23 = vpop.xlane.xlu0 %269 }
 0x384   :  { %v273_v24 = vmul.f32 0.0078125, %v270_v23 }
 0x385   :  { %v272_v25 = vpop.xlane.xlu1 %271 }
 0x386   :  { %v275_v26 = vadd.f32 1e-05, %v273_v24  ;;  %v274_v27 = vmul.f32 0.0078125, %v272_v25 }
 0x388   :  { %1316 = vrsqrt.f32 %v275_v26  ;;  %v276_v28 = vadd.f32 1e-05, %v274_v27 }
 0x38a   :  { %1318 = vrsqrt.f32 %v276_v28 }
 0x392   :  { %v1317_v29 = vpop.eup %1316 }
 0x393   :  { %v279_v31 = vmul.f32 %v1317_v29, %v1616_v57  ;;  %v1295_v57 = vld [vmem:[#allocation8 + $0x98] sm:$0xff]  }
 0x394   :  { %v1319_v32 = vpop.eup %1318 }
 0x395   :  { %v280_v33 = vmul.f32 %v1319_v32, %v1619_v59  ;;  %v287_v34 = vmul.f32 %v1059_v30, %v279_v31  ;;  %v1297_v59 = vld [vmem:[#allocation8 + $0xe0] sm:$0xff]  }
 0x397   :  { %v288_v36 = vmul.f32 %v1059_v30, %v280_v33  ;;  %v295_v37 = vadd.f32 %v1060_v35, %v287_v34 }
 0x399   :  { %v296_v38 = vadd.f32 %v1060_v35, %v288_v36 }
 0x39b   :  { %v297_v39 = vpack.c.bf16 %v296_v38, %v295_v37 }
 0x39d   :  { %544 = vmatmul.mubr.bf16.vlgmr.msra.gmra.mrb[0].mxu1 %v297_v39  ;;  %587 = vmatmul.mubr.bf16.vlgmr.msra.gmra.mrb[4].mxu0 %v297_v39 }
 0x39e   :  { %1149 = vmatpush3.bf16.msra.mxu1 %v1282_v43  ;;  %1171 = vmatpush3.bf16.msra.mxu0 %v1283_v44 }
 0x39f   :  { %1150 = vmatprep.subr.bf16.mxu1 %v1284_v46  ;;  %1172 = vmatprep.subr.bf16.mxu0 %v1285_v47 }
 0x3a2   :  { %1151 = vmatpush3.bf16.msra.mxu1 %v1286_v48  ;;  %1173 = vmatpush3.bf16.msra.mxu0 %v1287_v49 }
 0x3a3   :  { %1152 = vmatprep.subr.bf16.mxu1 %v1288_v50  ;;  %1174 = vmatprep.subr.bf16.mxu0 %v1289_v51 }
 0x3a6   :  { %1153 = vmatpush3.bf16.msra.mxu1 %v1290_v52  ;;  %1175 = vmatpush3.bf16.msra.mxu0 %v1291_v53 }
 0x3a7   :  { %1154 = vmatprep.subr.bf16.mxu1 %v1292_v54  ;;  %1176 = vmatprep.subr.bf16.mxu0 %v1293_v55 }
 0x3aa   :  { %1155 = vmatpush3.bf16.msra.mxu1 %v1294_v56  ;;  %1177 = vmatpush3.bf16.msra.mxu0 %v1295_v57 }
 0x3ab   :  { %1156 = vmatprep.subr.bf16.mxu1 %v1296_v58  ;;  %1178 = vmatprep.subr.bf16.mxu0 %v1297_v59 }
 0x3ae   :  { %1157 = vmatpush3.bf16.msra.mxu1 %v1298_v60  ;;  %1179 = vmatpush3.bf16.msra.mxu0 %v1299_v61 }
 0x3af   :  { %1158 = vmatprep.subr.bf16.mxu1 %v1300_v62  ;;  %1180 = vmatprep.subr.bf16.mxu0 %v1301_v63 }
 0x3b2   :  { %1159 = vmatpush3.bf16.msra.mxu1 %v1302_v0  ;;  %1181 = vmatpush3.bf16.msra.mxu0 %v1303_v1 }
 0x3b3   :  { %1160 = vmatprep.subr.bf16.mxu1 %v1304_v2  ;;  %1182 = vmatprep.subr.bf16.mxu0 %v1305_v3 }
 0x3b6   :  { %1161 = vmatpush3.bf16.msra.mxu1 %v1306_v4  ;;  %1183 = vmatpush3.bf16.msra.mxu0 %v1307_v5 }
 0x3b7   :  { %1162 = vmatprep.subr.bf16.mxu1 %v1308_v6  ;;  %1184 = vmatprep.subr.bf16.mxu0 %v1309_v7 }
 0x3ba   :  { %1163 = vmatpush3.bf16.msra.mxu1 %v1310_v8  ;;  %1185 = vmatpush3.bf16.msra.mxu0 %v1311_v9 }
 0x470   :  { %v545_v21 = vpop.f32.mrb[0].mxu1  ;;  %v588_v22 = vpop.f32.mrb[4].mxu0 }
 0x471   :  { %v1636_v23 = vadd.f32 %v545_v21, %v334_v17  ;;  %v1638_v24 = vadd.f32 %v588_v22, %v342_v18  ;;  %v547_v25 = vpop.f32.mrb[1].mxu1  ;;  %v590_v26 = vpop.f32.mrb[5].mxu0 }
 0x472   :  { %v1640_v27 = vadd.f32 %v547_v25, %v338_v19  ;;  %v1642_v28 = vadd.f32 %v590_v26, %v346_v20  ;;  %v549_v29 = vpop.f32.mrb[2].mxu1  ;;  %v592_v30 = vpop.f32.mrb[6].mxu0 }
 0x473   :  { %v605_v31 = vmul.f32 0.044715, %v1636_v23  ;;  %v607_v32 = vmul.f32 0.044715, %v1638_v24  ;;  %v550_v33 = vadd.f32 %v549_v29, %v334_v17  ;;  %v593_v34 = vadd.f32 %v592_v30, %v342_v18  ;;  %v551_v35 = vpop.f32.mrb[3].mxu1  ;;  %v594_v36 = vpop.f32.mrb[7].mxu0 }
 0x474   :  { %v606_v37 = vmul.f32 0.044715, %v1640_v27  ;;  %v608_v38 = vmul.f32 0.044715, %v1642_v28  ;;  %v1648_v39 = vadd.f32 %v551_v35, %v338_v19  ;;  %v1650_v40 = vadd.f32 %v594_v36, %v346_v20 }
 0x475   :  { %v613_v41 = vmul.f32 %v605_v31, %v1636_v23  ;;  %v615_v43 = vmul.f32 %v607_v32, %v1638_v24  ;;  %v609_v44 = vmul.f32 0.044715, %v550_v33  ;;  %v611_v46 = vmul.f32 0.044715, %v593_v34 }
 0x476   :  { %v614_v47 = vmul.f32 %v606_v37, %v1640_v27  ;;  %v616_v48 = vmul.f32 %v608_v38, %v1642_v28  ;;  %v610_v49 = vmul.f32 0.044715, %v1648_v39  ;;  %v612_v50 = vmul.f32 0.044715, %v1650_v40 }
 0x477   :  { %v621_v51 = vmul.f32 %v613_v41, %v1636_v23  ;;  %v623_v52 = vmul.f32 %v615_v43, %v1638_v24  ;;  %v617_v53 = vmul.f32 %v609_v44, %v550_v33  ;;  %v619_v54 = vmul.f32 %v611_v46, %v593_v34 }
 0x478   :  { %v622_v55 = vmul.f32 %v614_v47, %v1640_v27  ;;  %v624_v56 = vmul.f32 %v616_v48, %v1642_v28  ;;  %v618_v57 = vmul.f32 %v610_v49, %v1648_v39  ;;  %v620_v58 = vmul.f32 %v612_v50, %v1650_v40 }
 0x479   :  { %v629_v59 = vadd.f32 %v621_v51, %v1636_v23  ;;  %v631_v60 = vadd.f32 %v623_v52, %v1638_v24  ;;  %v625_v61 = vmul.f32 %v617_v53, %v550_v33  ;;  %v627_v62 = vmul.f32 %v619_v54, %v593_v34 }
 0x47a   :  { %v626_v63 = vmul.f32 %v618_v57, %v1648_v39  ;;  %v628_v0 = vmul.f32 %v620_v58, %v1650_v40  ;;  %v630_v5 = vadd.f32 %v622_v55, %v1640_v27  ;;  %v632_v9 = vadd.f32 %v624_v56, %v1642_v28 }
 0x47b   :  { %v637_v1 = vmul.f32 0.7978846, %v629_v59  ;;  %v639_v2 = vmul.f32 0.7978846, %v631_v60  ;;  %v633_v3 = vadd.f32 %v625_v61, %v550_v33  ;;  %v635_v4 = vadd.f32 %v627_v62, %v593_v34 }
 0x47c   :  { %v634_v6 = vadd.f32 %v626_v63, %v1648_v39  ;;  %v638_v10 = vmul.f32 0.7978846, %v630_v5  ;;  %v636_v12 = vadd.f32 %v628_v0, %v1650_v40  ;;  %v640_v13 = vmul.f32 0.7978846, %v632_v9 }
 0x47d   :  { %1320 = vtanh.f32 %v637_v1  ;;  %v641_v7 = vmul.f32 0.7978846, %v633_v3  ;;  %v643_v8 = vmul.f32 0.7978846, %v635_v4  ;;  %v597_v21 = vmul.f32 0.5, %v1636_v23 }
 0x47e   :  { %1322 = vtanh.f32 %v639_v2  ;;  %v642_v11 = vmul.f32 0.7978846, %v634_v6  ;;  %v644_v14 = vmul.f32 0.7978846, %v636_v12  ;;  %v601_v22 = vmul.f32 0.5, %v550_v33 }
 0x47f   :  { %1324 = vtanh.f32 %v641_v7  ;;  %v599_v29 = vmul.f32 0.5, %v1638_v24  ;;  %v603_v30 = vmul.f32 0.5, %v593_v34  ;;  %v598_v35 = vmul.f32 0.5, %v1640_v27 }
 0x480   :  { %1326 = vtanh.f32 %v643_v8  ;;  %v602_v43 = vmul.f32 0.5, %v1648_v39  ;;  %v600_v33 = vmul.f32 0.5, %v1642_v28  ;;  %v604_v48 = vmul.f32 0.5, %v1650_v40  ;;  %v1093_v28 = vld [vmem:[%s1708_s10] ss:$0 sm:$0xff]  ;;  %s1424_s10 = scalar_lea.vmem %s1035_s21, 128 }
 0x481   :  { %1328 = vtanh.f32 %v638_v10  ;;  %p1425_p4 = scmp.ne.s32.totalorder %s1035_s21, %s1424_s10  ;;  %p1430_p6 = scmp.lt.s32.totalorder %s1424_s10, %s1424_s10 }
 0x482   :  { %1330 = vtanh.f32 %v642_v11 }
 0x483   :  { %1332 = vtanh.f32 %v640_v13  ;;  %p1431_p7 = por %p1430_p6, %p1429_p5 }
 0x484   :  { %1334 = vtanh.f32 %v644_v14 }
 0x485   :  { %p1432_p8 = pnand %p1431_p7, %p1425_p4 }
 0x487   :  { %v1321_v15 = vpop.eup %1320 }
 0x488   :  { %v1323_v16 = vpop.eup %1322  ;;  %v653_v17 = vadd.f32 1.0, %v1321_v15 }
 0x489   :  { %v1325_v18 = vpop.eup %1324  ;;  %v655_v19 = vadd.f32 1.0, %v1323_v16 }
 0x48a   :  { %v1327_v20 = vpop.eup %1326  ;;  %v657_v25 = vadd.f32 1.0, %v1325_v18  ;;  %v661_v37 = vmul.f32 %v653_v17, %v597_v21 }
 0x48b   :  { %v1329_v26 = vpop.eup %1328  ;;  %v659_v31 = vadd.f32 1.0, %v1327_v20  ;;  %v663_v46 = vmul.f32 %v655_v19, %v599_v29 }
 0x48c   :  { %v1331_v32 = vpop.eup %1330  ;;  %v654_v36 = vadd.f32 1.0, %v1329_v26  ;;  %v665_v38 = vmul.f32 %v657_v25, %v601_v22 }
 0x48d   :  { %v1333_v41 = vpop.eup %1332  ;;  %v658_v44 = vadd.f32 1.0, %v1331_v32  ;;  %v667_v47 = vmul.f32 %v659_v31, %v603_v30 }
 0x48e   :  { %v1335_v23 = vpop.eup %1334  ;;  %v656_v24 = vadd.f32 1.0, %v1333_v41  ;;  %v669_v34 = vpack.c.bf16 %v665_v38, %v661_v37  ;;  %v662_v49 = vmul.f32 %v654_v36, %v598_v35 }
 0x48f   :  { %v666_v50 = vmul.f32 %v658_v44, %v602_v43  ;;  %v660_v51 = vadd.f32 1.0, %v1335_v23  ;;  %v671_v27 = vpack.c.bf16 %v667_v47, %v663_v46 }
 0x490   :  { %v664_v53 = vmul.f32 %v656_v24, %v600_v33 }
 0x491   :  { %v670_v52 = vpack.c.bf16 %v666_v50, %v662_v49  ;;  %v668_v54 = vmul.f32 %v660_v51, %v604_v48 }
 0x493   :  { %967 = vmatprep.mubr.bf16.mxu1 %v670_v52  ;;  %v672_v55 = vpack.c.bf16 %v668_v54, %v664_v53 }
 0x494   :  { %968 = vmatmul.mubr.bf16.vlgmr.msra.gmra.mrb[4].mxu1 %v669_v34 }
 0x495   :  { %1008 = vmatprep.mubr.bf16.mxu0 %v672_v55 }
 0x496   :  { %1009 = vmatmul.mubr.bf16.vlgmr.msra.gmra.mrb[8].mxu0 %v671_v27 }
 0x567   :  { %v1164_v39 = vpop.f32.mrb[4].mxu1 }
 0x568   :  { %v1165_v40 = vpop.f32.mrb[5].mxu1 }
 0x569   :  { %v1186_v56 = vpop.f32.mrb[8].mxu0  ;;  %v1166_v57 = vadd.f32 %v1165_v40, %v1164_v39  ;;  %v1167_v58 = vpop.f32.mrb[6].mxu1 }
 0x56a   :  { %v1187_v59 = vpop.f32.mrb[9].mxu0  ;;  %v1168_v60 = vpop.f32.mrb[7].mxu1 }
 0x56b   :  { %v970_v61 = vadd.f32 %v1166_v57, %v1093_v28  ;;  %v1188_v62 = vadd.f32 %v1187_v59, %v1186_v56  ;;  %v1189_v63 = vpop.f32.mrb[10].mxu0  ;;  %v1169_v0 = vadd.f32 %v1168_v60, %v1167_v58 }
 0x56c   :  { %v1190_v1 = vpop.f32.mrb[11].mxu0 }
 0x56d   :  { %v1011_v2 = vadd.f32 %v1188_v62, %v970_v61  ;;  %v973_v3 = vadd.f32 %v1169_v0, %v1093_v28  ;;  %v1191_v4 = vadd.f32 %v1190_v1, %v1189_v63 }
 0x56f   :  { %v1014_v5 = vadd.f32 %v1191_v4, %v973_v3  ;;  %v1017_v6 = vadd.f32 %v1011_v2, %v1608_v42 }
 0x571   :  { %v1018_v7 = vadd.f32 %v1014_v5, %v1611_v45 }
 0x573   :  { %v1137_v8 = vpack.c.bf16 %v1018_v7, %v1017_v6 }
 0x575   :  { %1138 = vst [vmem:[#allocation10] sm:$0xff] %v1137_v8  }
 0x576   :  { %1435 = shalt.err (!%p1432_p8)
}
 0x577   :  { %s1436_s3 = scalar_lea.hbm %s1709_s11, 128 }
 0x578   :  { %p1437_p9 = scmp.ne.s32.totalorder %s1709_s11, %s1436_s3  ;;  %p1440_p10 = scmp.lt.u32.totalorder %s1436_s3, %s1709_s11 }
 0x57a   :  { %p1442_p11 = pnand %p1440_p10, %p1437_p9 }
 0x57c   :  { %1445 = shalt.err (!%p1442_p11)
}
 0x57d   :  { %1040 = dma.vmem_to_hbm [thread:$0]  %s1035_s21, 128, %s1709_s11, [#allocation4], %s1456_s29, %s1456_s29, %s1457_s30  }
 0x57e   :  { %1452 = dma.done.wait [#allocation4], 128  }
 0x57f   :  { %1453 = vsyncadd [#allocation4], 4294967168 }
 0x580   :  { %1044 = vsyncpa [#allocation3], 1 }
 0x581   :  { %1045 = vsyncpa [#allocation6], 1 }
 0x582   :  { %1046 = vsyncpa [#allocation9], 1 }
 0x583   :  { %1047 = vsyncpa [#allocation4], 1 }

</bundles_post_ra>
